<compile_context>
chip_gen: v5e
topology: v5e:2x2
jax: 0.10.0
libtpu: 0.0.40
codegen_flags: <defaults>
</compile_context>

<pallas_src>
import jax
import jax.numpy as jnp
from jax.experimental import pallas as pl
from jax.experimental.pallas import tpu as pltpu

EPS = 1e-5  # PyTorch InstanceNorm2d default eps (affine=False)


def _round_up(v, m):
    return ((v + m - 1) // m) * m


def _make_kernel(nb, hw_true, hw_pad, unroll):
    inv_hw = 1.0 / float(hw_true)
    need_mask = hw_pad != hw_true

    def kernel(g_ref, x_ref, wg_ref, wx_ref, w1_ref, w2_ref, out_ref):
        # Lane mask for padded spatial columns (hoisted out of the sample loop;
        # broadcast_in_dim is not CSE'd by JAX).
        if need_mask:
            lane = jax.lax.broadcasted_iota(jnp.int32, (1, hw_pad), 1)
            mask = (lane < hw_true).astype(jnp.float32)
        else:
            mask = None

        def _inorm(y):
            # Mean via lane-sum (padded columns are exact zeros, so the sum is
            # exact with the true 1/HW).  Centered two-pass variance: the
            # centered difference is reused for the output, so this costs no
            # extra full VPU pass vs. E[y^2]-mu^2 and avoids cancellation.
            mu = jnp.sum(y, axis=-1, keepdims=True) * inv_hw
            d = y - mu
            if mask is not None:
                d = d * mask  # zero padded lanes: exact var + clean next conv
            var = jnp.sum(d * d, axis=-1, keepdims=True) * inv_hw
            return d * jax.lax.rsqrt(var + EPS)

        @pl.loop(0, nb, unroll=unroll)
        def _(n):
            # 1x1 convs as channel matmuls, fed directly in the I/O dtype
            # (f32 accumulation via preferred_element_type).  Biases are
            # algebraically dead under affine=False InstanceNorm.
            g1 = _inorm(jnp.dot(wg_ref[...], g_ref[n],
                                preferred_element_type=jnp.float32))
            x1 = _inorm(jnp.dot(wx_ref[...], x_ref[n],
                                preferred_element_type=jnp.float32))

            psi = jnp.maximum(g1 + x1, 0.0)                              # ReLU
            psi = jnp.maximum(
                _inorm(jnp.dot(w1_ref[...], psi,
                               preferred_element_type=jnp.float32)), 0.0)
            psi = jax.nn.sigmoid(
                _inorm(jnp.dot(w2_ref[...], psi,
                               preferred_element_type=jnp.float32)))      # (1, HW)

            # Re-read x from the resident VMEM input buffer; multiply in the
            # I/O dtype (cast the tiny psi, not a full x slab).
            out_ref[n] = x_ref[n] * psi.astype(out_ref.dtype)

    return kernel


def attention_gates(g, x, params):
    """g: (N, F_l, HW), x: (N, F_g, HW); returns (N, F_g, HW) in x.dtype.

    f32 or bf16 inputs accepted (bf16 halves HBM traffic and runs the MXU at
    its native bf16 rate; accumulation / norms stay f32).
    """
    N, F_l, HW = g.shape
    F_g = x.shape[1]

    io_dtype = x.dtype
    io_bytes = jnp.dtype(io_dtype).itemsize

    # First-layer weights in the I/O dtype so bf16 slabs hit the MXU without a
    # promotion pass; later convs consume f32 intermediates, keep f32 weights.
    wg = params["wg"].astype(io_dtype)
    wx = params["wx"].astype(io_dtype)
    w1 = params["w1"].astype(jnp.float32)
    w2 = params["w2"].astype(jnp.float32)
    F_int = wg.shape[0]

    # ---- lane-dense spatial padding (multiple of 128) ----------------------
    hw_pad = _round_up(HW, 128)
    if hw_pad != HW:
        g = jnp.pad(g, ((0, 0), (0, 0), (0, hw_pad - HW)))
        x = jnp.pad(x, ((0, 0), (0, 0), (0, hw_pad - HW)))

    # ---- generation-aware VMEM sizing ---------------------------------------
    try:
        vmem_cap = int(pltpu.get_tpu_info().vmem_capacity_bytes)
    except Exception:
        vmem_cap = 64 << 20  # conservative: v7x per-TC VMEM
    budget = vmem_cap // 2

    sub_io = 8 * (4 // io_bytes)  # sublane packing: 8 rows f32, 16 rows bf16
    # Per-sample pipelined working set, with sublane/lane tile padding:
    # double-buffered g/x/out slabs + live f32 intermediates (g1, x1, psi
    # chain, psi (1,HW) occupying one 8-row tile).
    per_sample = (
        2 * (_round_up(F_l, sub_io) + 2 * _round_up(F_g, sub_io)) * hw_pad * io_bytes
        + (3 * _round_up(F_int, 8) + 8) * hw_pad * 4
    )

    nb = max(1, min(N, budget // max(per_sample, 1)))
    # >= min(N, 4) grid steps: two pipelined steps per TensorCore on v7x, and
    # DMA/compute overlap on single-TC parts.
    min_steps = min(N, 4)
    nb = max(1, min(nb, max(1, N // max(min_steps, 1))))

    # Pad N up to a multiple of nb instead of shrinking nb for awkward N.
    n_pad = _round_up(N, nb)
    if n_pad != N:
        g = jnp.pad(g, ((0, n_pad - N), (0, 0), (0, 0)))
        x = jnp.pad(x, ((0, n_pad - N), (0, 0), (0, 0)))

    w_bytes = sum(
        _round_up(w.shape[0], 8) * _round_up(w.shape[1], 128) * 4
        for w in (wg, wx, w1, w2)
    )
    est = nb * per_sample + 2 * w_bytes + (2 << 20)
    vmem_limit = int(min(vmem_cap * 3 // 4, max(2 * est, 32 << 20)))

    kernel = _make_kernel(nb, HW, hw_pad, unroll=bool(nb <= 8))

    def wspec(arr):
        return pl.BlockSpec(arr.shape, lambda i: (0, 0))

    out = pl.pallas_call(
        kernel,
        out_shape=jax.ShapeDtypeStruct((n_pad, F_g, hw_pad), io_dtype),
        grid_spec=pltpu.PrefetchScalarGridSpec(
            num_scalar_prefetch=0,
            grid=(n_pad // nb,),
            in_specs=[
                pl.BlockSpec((nb, F_l, hw_pad), lambda i: (i, 0, 0)),
                pl.BlockSpec((nb, F_g, hw_pad), lambda i: (i, 0, 0)),
                wspec(wg), wspec(wx), wspec(w1), wspec(w2),
            ],
            out_specs=pl.BlockSpec((nb, F_g, hw_pad), lambda i: (i, 0, 0)),
        ),
        compiler_params=pltpu.CompilerParams(
            dimension_semantics=("parallel",),
            vmem_limit_bytes=vmem_limit,
        ),
    )(g, x, wg, wx, w1, w2)

    if n_pad != N or hw_pad != HW:
        out = out[:N, :, :HW]
    return out


def reference(g, x, p):
    """Plain-JAX reference matching the PyTorch forward (WITH biases)."""
    def conv1x1(h, w, b):          # h: (N, Cin, HW), w: (Cout, Cin), b: (Cout, 1)
        return jnp.einsum("oc,nch->noh", w, h) + b[None, :, :]

    def inorm(y):
        mu = y.mean(-1, keepdims=True)
        var = ((y - mu) ** 2).mean(-1, keepdims=True)
        return (y - mu) / jnp.sqrt(var + EPS)

    g1 = inorm(conv1x1(g, p["wg"], p["bg"]))
    x1 = inorm(conv1x1(x, p["wx"], p["bx"]))
    psi = jax.nn.relu(g1 + x1)
    psi = jax.nn.relu(inorm(conv1x1(psi, p["w1"], p["b1"])))
    psi = jax.nn.sigmoid(inorm(conv1x1(psi, p["w2"], p["b2"])))
    return x * psi


if __name__ == "__main__":
    N, F_g, F_l, F_int, H, W = 2, 4, 4, 8, 16, 16
    HW = H * W

    key = jax.random.PRNGKey(0)
    keys = jax.random.split(key, 12)
    (kg, kx, k0, k1, k2, k3, k4, k5, k6, k7, kg2, kx2) = keys

    g = jax.random.normal(kg, (N, F_l, H, W), jnp.float32).reshape(N, F_l, HW)
    x = jax.random.normal(kx, (N, F_g, H, W), jnp.float32).reshape(N, F_g, HW)

    # Conv2d 1x1 weights squeezed to (Cout, Cin); biases as (Cout, 1).
    # Biases are only consumed by the reference — they are a no-op under
    # affine=False InstanceNorm, so the kernel never loads them.
    params = {
        "wg": 0.1 * jax.random.normal(k0, (F_int, F_l), jnp.float32),
        "bg": 0.1 * jax.random.normal(k1, (F_int, 1), jnp.float32),
        "wx": 0.1 * jax.random.normal(k2, (F_int, F_g), jnp.float32),
        "bx": 0.1 * jax.random.normal(k3, (F_int, 1), jnp.float32),
        "w1": 0.1 * jax.random.normal(k4, (F_int, F_int), jnp.float32),
        "b1": 0.1 * jax.random.normal(k5, (F_int, 1), jnp.float32),
        "w2": 0.1 * jax.random.normal(k6, (1, F_int), jnp.float32),
        "b2": 0.1 * jax.random.normal(k7, (1, 1), jnp.float32),
    }

    # ---- f32, lane-aligned spatial (16x16) ---------------------------------
    out = jax.block_until_ready(attention_gates(g, x, params))
    ref = reference(g, x, params)
    assert out.shape == (N, F_g, HW)
    assert jnp.allclose(out, ref, atol=1e-4, rtol=1e-4), "f32 mismatch"

    # ---- f32, non-multiple-of-128 spatial (14x14): exercises lane padding ---
    N2, H2, W2 = 3, 14, 14
    HW2 = H2 * W2
    g2 = jax.random.normal(kg2, (N2, F_l, H2, W2), jnp.float32).reshape(N2, F_l, HW2)
    x2 = jax.random.normal(kx2, (N2, F_g, H2, W2), jnp.float32).reshape(N2, F_g, HW2)
    out2 = jax.block_until_ready(attention_gates(g2, x2, params))
    ref2 = reference(g2, x2, params)
    assert out2.shape == (N2, F_g, HW2)
    assert jnp.allclose(out2, ref2, atol=1e-4, rtol=1e-4), "padded-HW mismatch"

    # ---- bf16 I/O path (loose tolerance vs. the f32 reference) -------------
    out_bf = jax.block_until_ready(
        attention_gates(g.astype(jnp.bfloat16), x.astype(jnp.bfloat16), params))
    assert out_bf.dtype == jnp.bfloat16
    assert jnp.allclose(out_bf.astype(jnp.float32), ref, atol=5e-2, rtol=5e-2), \
        "bf16 mismatch"

    print("KERNEL_OK")
</pallas_src>

<mosaic_0001>
module attributes {stable_mosaic.version = 11 : i64} {
  func.func @kernel(%arg0: i32, %arg1: memref<1x4x256xf32, #tpu.memory_space<vmem>>, %arg2: memref<1x4x256xf32, #tpu.memory_space<vmem>>, %arg3: memref<8x4xf32, #tpu.memory_space<vmem>>, %arg4: memref<8x4xf32, #tpu.memory_space<vmem>>, %arg5: memref<8x8xf32, #tpu.memory_space<vmem>>, %arg6: memref<1x8xf32, #tpu.memory_space<vmem>>, %arg7: memref<1x4x256xf32, #tpu.memory_space<vmem>>) attributes {dimension_semantics = [#tpu.dimension_semantics<parallel>], iteration_bounds = array<i64: 2>, scalar_prefetch = 0 : i64, scratch_operands = 0 : i64, tpu.core_type = #tpu.core_type<tc>, window_params = [{transform_indices = @transform_0, window_bounds = array<i64: 1, 4, 256>}, {transform_indices = @transform_1, window_bounds = array<i64: 1, 4, 256>}, {pipeline_mode = #tpu.pipeline_mode<synchronous>, transform_indices = @transform_2, window_bounds = array<i64: 8, 4>}, {pipeline_mode = #tpu.pipeline_mode<synchronous>, transform_indices = @transform_3, window_bounds = array<i64: 8, 4>}, {pipeline_mode = #tpu.pipeline_mode<synchronous>, transform_indices = @transform_4, window_bounds = array<i64: 8, 8>}, {pipeline_mode = #tpu.pipeline_mode<synchronous>, transform_indices = @transform_5, window_bounds = array<i64: 1, 8>}, {transform_indices = @transform_6, window_bounds = array<i64: 1, 4, 256>}]} {
    %c0_i32 = arith.constant 0 : i32
    %c1_i32 = arith.constant 1 : i32
    %0 = arith.muli %c0_i32, %c1_i32 : i32
    %c0_i32_0 = arith.constant 0 : i32
    %1 = arith.addi %c0_i32_0, %0 : i32
    %c0 = arith.constant 0 : index
    %c0_1 = arith.constant 0 : index
    %2 = vector.load %arg3[%c0, %c0_1] : memref<8x4xf32, #tpu.memory_space<vmem>>, vector<8x4xf32>
    %3 = arith.index_cast %1 : i32 to index
    %c0_2 = arith.constant 0 : index
    %c0_3 = arith.constant 0 : index
    %4 = vector.load %arg1[%3, %c0_2, %c0_3] : memref<1x4x256xf32, #tpu.memory_space<vmem>>, vector<1x4x256xf32>
    %5 = vector.shape_cast %4 : vector<1x4x256xf32> to vector<4x256xf32>
    %cst = arith.constant dense<0.000000e+00> : vector<8x256xf32>
    %6 = tpu.matmul %2, %5, %cst {dimension_numbers = #tpu.dot_dimension_numbers<[1], [0], [0], [1], [0, 0, 1, 1], [], []>} : vector<8x4xf32>, vector<4x256xf32>, vector<8x256xf32> -> vector<8x256xf32>
    %cst_4 = arith.constant dense<0.000000e+00> : vector<8xf32>
    %7 = vector.multi_reduction <add>, %6, %cst_4 [1] : vector<8x256xf32> to vector<8xf32>
    %8 = vector.shape_cast %7 : vector<8xf32> to vector<8x1xf32>
    %cst_5 = arith.constant 3.906250e-03 : f32
    %9 = vector.broadcast %cst_5 : f32 to vector<8x1xf32>
    %10 = arith.mulf %8, %9 : vector<8x1xf32>
    %11 = vector.broadcast %10 : vector<8x1xf32> to vector<8x256xf32>
    %12 = arith.subf %6, %11 : vector<8x256xf32>
    %13 = arith.mulf %12, %12 : vector<8x256xf32>
    %cst_6 = arith.constant dense<0.000000e+00> : vector<8xf32>
    %14 = vector.multi_reduction <add>, %13, %cst_6 [1] : vector<8x256xf32> to vector<8xf32>
    %15 = vector.shape_cast %14 : vector<8xf32> to vector<8x1xf32>
    %cst_7 = arith.constant 3.906250e-03 : f32
    %16 = vector.broadcast %cst_7 : f32 to vector<8x1xf32>
    %17 = arith.mulf %15, %16 : vector<8x1xf32>
    %cst_8 = arith.constant 9.99999974E-6 : f32
    %18 = vector.broadcast %cst_8 : f32 to vector<8x1xf32>
    %19 = arith.addf %17, %18 : vector<8x1xf32>
    %20 = math.rsqrt %19 : vector<8x1xf32>
    %21 = vector.broadcast %20 : vector<8x1xf32> to vector<8x256xf32>
    %22 = arith.mulf %12, %21 : vector<8x256xf32>
    %c0_9 = arith.constant 0 : index
    %c0_10 = arith.constant 0 : index
    %23 = vector.load %arg4[%c0_9, %c0_10] : memref<8x4xf32, #tpu.memory_space<vmem>>, vector<8x4xf32>
    %24 = arith.index_cast %1 : i32 to index
    %c0_11 = arith.constant 0 : index
    %c0_12 = arith.constant 0 : index
    %25 = vector.load %arg2[%24, %c0_11, %c0_12] : memref<1x4x256xf32, #tpu.memory_space<vmem>>, vector<1x4x256xf32>
    %26 = vector.shape_cast %25 : vector<1x4x256xf32> to vector<4x256xf32>
    %cst_13 = arith.constant dense<0.000000e+00> : vector<8x256xf32>
    %27 = tpu.matmul %23, %26, %cst_13 {dimension_numbers = #tpu.dot_dimension_numbers<[1], [0], [0], [1], [0, 0, 1, 1], [], []>} : vector<8x4xf32>, vector<4x256xf32>, vector<8x256xf32> -> vector<8x256xf32>
    %cst_14 = arith.constant dense<0.000000e+00> : vector<8xf32>
    %28 = vector.multi_reduction <add>, %27, %cst_14 [1] : vector<8x256xf32> to vector<8xf32>
    %29 = vector.shape_cast %28 : vector<8xf32> to vector<8x1xf32>
    %cst_15 = arith.constant 3.906250e-03 : f32
    %30 = vector.broadcast %cst_15 : f32 to vector<8x1xf32>
    %31 = arith.mulf %29, %30 : vector<8x1xf32>
    %32 = vector.broadcast %31 : vector<8x1xf32> to vector<8x256xf32>
    %33 = arith.subf %27, %32 : vector<8x256xf32>
    %34 = arith.mulf %33, %33 : vector<8x256xf32>
    %cst_16 = arith.constant dense<0.000000e+00> : vector<8xf32>
    %35 = vector.multi_reduction <add>, %34, %cst_16 [1] : vector<8x256xf32> to vector<8xf32>
    %36 = vector.shape_cast %35 : vector<8xf32> to vector<8x1xf32>
    %cst_17 = arith.constant 3.906250e-03 : f32
    %37 = vector.broadcast %cst_17 : f32 to vector<8x1xf32>
    %38 = arith.mulf %36, %37 : vector<8x1xf32>
    %cst_18 = arith.constant 9.99999974E-6 : f32
    %39 = vector.broadcast %cst_18 : f32 to vector<8x1xf32>
    %40 = arith.addf %38, %39 : vector<8x1xf32>
    %41 = math.rsqrt %40 : vector<8x1xf32>
    %42 = vector.broadcast %41 : vector<8x1xf32> to vector<8x256xf32>
    %43 = arith.mulf %33, %42 : vector<8x256xf32>
    %44 = arith.addf %22, %43 : vector<8x256xf32>
    %cst_19 = arith.constant 0.000000e+00 : f32
    %45 = vector.broadcast %cst_19 : f32 to vector<8x256xf32>
    %46 = arith.maximumf %44, %45 : vector<8x256xf32>
    %c0_20 = arith.constant 0 : index
    %c0_21 = arith.constant 0 : index
    %47 = vector.load %arg5[%c0_20, %c0_21] : memref<8x8xf32, #tpu.memory_space<vmem>>, vector<8x8xf32>
    %cst_22 = arith.constant dense<0.000000e+00> : vector<8x256xf32>
    %48 = tpu.matmul %47, %46, %cst_22 {dimension_numbers = #tpu.dot_dimension_numbers<[1], [0], [0], [1], [0, 0, 1, 1], [], []>} : vector<8x8xf32>, vector<8x256xf32>, vector<8x256xf32> -> vector<8x256xf32>
    %cst_23 = arith.constant dense<0.000000e+00> : vector<8xf32>
    %49 = vector.multi_reduction <add>, %48, %cst_23 [1] : vector<8x256xf32> to vector<8xf32>
    %50 = vector.shape_cast %49 : vector<8xf32> to vector<8x1xf32>
    %cst_24 = arith.constant 3.906250e-03 : f32
    %51 = vector.broadcast %cst_24 : f32 to vector<8x1xf32>
    %52 = arith.mulf %50, %51 : vector<8x1xf32>
    %53 = vector.broadcast %52 : vector<8x1xf32> to vector<8x256xf32>
    %54 = arith.subf %48, %53 : vector<8x256xf32>
    %55 = arith.mulf %54, %54 : vector<8x256xf32>
    %cst_25 = arith.constant dense<0.000000e+00> : vector<8xf32>
    %56 = vector.multi_reduction <add>, %55, %cst_25 [1] : vector<8x256xf32> to vector<8xf32>
    %57 = vector.shape_cast %56 : vector<8xf32> to vector<8x1xf32>
    %cst_26 = arith.constant 3.906250e-03 : f32
    %58 = vector.broadcast %cst_26 : f32 to vector<8x1xf32>
    %59 = arith.mulf %57, %58 : vector<8x1xf32>
    %cst_27 = arith.constant 9.99999974E-6 : f32
    %60 = vector.broadcast %cst_27 : f32 to vector<8x1xf32>
    %61 = arith.addf %59, %60 : vector<8x1xf32>
    %62 = math.rsqrt %61 : vector<8x1xf32>
    %63 = vector.broadcast %62 : vector<8x1xf32> to vector<8x256xf32>
    %64 = arith.mulf %54, %63 : vector<8x256xf32>
    %cst_28 = arith.constant 0.000000e+00 : f32
    %65 = vector.broadcast %cst_28 : f32 to vector<8x256xf32>
    %66 = arith.maximumf %64, %65 : vector<8x256xf32>
    %c0_29 = arith.constant 0 : index
    %c0_30 = arith.constant 0 : index
    %67 = vector.load %arg6[%c0_29, %c0_30] : memref<1x8xf32, #tpu.memory_space<vmem>>, vector<1x8xf32>
    %cst_31 = arith.constant dense<0.000000e+00> : vector<1x256xf32>
    %68 = tpu.matmul %67, %66, %cst_31 {dimension_numbers = #tpu.dot_dimension_numbers<[1], [0], [0], [1], [0, 0, 1, 1], [], []>} : vector<1x8xf32>, vector<8x256xf32>, vector<1x256xf32> -> vector<1x256xf32>
    %cst_32 = arith.constant dense<0.000000e+00> : vector<1xf32>
    %69 = vector.multi_reduction <add>, %68, %cst_32 [1] : vector<1x256xf32> to vector<1xf32>
    %70 = vector.shape_cast %69 : vector<1xf32> to vector<1x1xf32>
    %cst_33 = arith.constant 3.906250e-03 : f32
    %71 = vector.broadcast %cst_33 : f32 to vector<1x1xf32>
    %72 = arith.mulf %70, %71 : vector<1x1xf32>
    %73 = vector.broadcast %72 : vector<1x1xf32> to vector<1x256xf32>
    %74 = arith.subf %68, %73 : vector<1x256xf32>
    %75 = arith.mulf %74, %74 : vector<1x256xf32>
    %cst_34 = arith.constant dense<0.000000e+00> : vector<1xf32>
    %76 = vector.multi_reduction <add>, %75, %cst_34 [1] : vector<1x256xf32> to vector<1xf32>
    %77 = vector.shape_cast %76 : vector<1xf32> to vector<1x1xf32>
    %cst_35 = arith.constant 3.906250e-03 : f32
    %78 = vector.broadcast %cst_35 : f32 to vector<1x1xf32>
    %79 = arith.mulf %77, %78 : vector<1x1xf32>
    %cst_36 = arith.constant 9.99999974E-6 : f32
    %80 = vector.broadcast %cst_36 : f32 to vector<1x1xf32>
    %81 = arith.addf %79, %80 : vector<1x1xf32>
    %82 = math.rsqrt %81 : vector<1x1xf32>
    %83 = vector.broadcast %82 : vector<1x1xf32> to vector<1x256xf32>
    %84 = arith.mulf %74, %83 : vector<1x256xf32>
    %85 = arith.negf %84 : vector<1x256xf32>
    %86 = math.exp %85 : vector<1x256xf32>
    %cst_37 = arith.constant 1.000000e+00 : f32
    %87 = vector.broadcast %cst_37 : f32 to vector<1x256xf32>
    %88 = arith.addf %87, %86 : vector<1x256xf32>
    %89 = arith.divf %87, %88 : vector<1x256xf32>
    %90 = arith.index_cast %1 : i32 to index
    %c0_38 = arith.constant 0 : index
    %c0_39 = arith.constant 0 : index
    %91 = vector.load %arg2[%90, %c0_38, %c0_39] : memref<1x4x256xf32, #tpu.memory_space<vmem>>, vector<1x4x256xf32>
    %92 = vector.shape_cast %91 : vector<1x4x256xf32> to vector<4x256xf32>
    %93 = vector.broadcast %89 : vector<1x256xf32> to vector<4x256xf32>
    %94 = arith.mulf %92, %93 : vector<4x256xf32>
    %95 = arith.index_cast %1 : i32 to index
    %c0_40 = arith.constant 0 : index
    %c0_41 = arith.constant 0 : index
    %96 = vector.load %arg7[%95, %c0_40, %c0_41] : memref<1x4x256xf32, #tpu.memory_space<vmem>>, vector<1x4x256xf32>
    %97 = vector.shape_cast %96 : vector<1x4x256xf32> to vector<4x256xf32>
    %98 = vector.shape_cast %94 : vector<4x256xf32> to vector<1x4x256xf32>
    tpu.vector_store %arg7[%95, %c0_40, %c0_41], %98 {strides = array<i32>} : memref<1x4x256xf32, #tpu.memory_space<vmem>>, vector<1x4x256xf32>,
    %c1_i32_42 = arith.constant 1 : i32
    return
  }
  func.func @transform_0(%arg0: i32) -> (i32, i32, i32) {
    %c0_i32 = arith.constant 0 : i32
    %c0_i32_0 = arith.constant 0 : i32
    %c0_i32_1 = arith.constant 0 : i32
    return %arg0, %c0_i32, %c0_i32_0 : i32, i32, i32
  }
  func.func @transform_1(%arg0: i32) -> (i32, i32, i32) {
    %c0_i32 = arith.constant 0 : i32
    %c0_i32_0 = arith.constant 0 : i32
    %c0_i32_1 = arith.constant 0 : i32
    return %arg0, %c0_i32, %c0_i32_0 : i32, i32, i32
  }
  func.func @transform_2(%arg0: i32) -> (i32, i32) {
    %c0_i32 = arith.constant 0 : i32
    %c0_i32_0 = arith.constant 0 : i32
    %c0_i32_1 = arith.constant 0 : i32
    return %c0_i32, %c0_i32_0 : i32, i32
  }
  func.func @transform_3(%arg0: i32) -> (i32, i32) {
    %c0_i32 = arith.constant 0 : i32
    %c0_i32_0 = arith.constant 0 : i32
    %c0_i32_1 = arith.constant 0 : i32
    return %c0_i32, %c0_i32_0 : i32, i32
  }
  func.func @transform_4(%arg0: i32) -> (i32, i32) {
    %c0_i32 = arith.constant 0 : i32
    %c0_i32_0 = arith.constant 0 : i32
    %c0_i32_1 = arith.constant 0 : i32
    return %c0_i32, %c0_i32_0 : i32, i32
  }
  func.func @transform_5(%arg0: i32) -> (i32, i32) {
    %c0_i32 = arith.constant 0 : i32
    %c0_i32_0 = arith.constant 0 : i32
    %c0_i32_1 = arith.constant 0 : i32
    return %c0_i32, %c0_i32_0 : i32, i32
  }
  func.func @transform_6(%arg0: i32) -> (i32, i32, i32) {
    %c0_i32 = arith.constant 0 : i32
    %c0_i32_0 = arith.constant 0 : i32
    %c0_i32_1 = arith.constant 0 : i32
    return %arg0, %c0_i32, %c0_i32_0 : i32, i32, i32
  }
}

</mosaic_0001>

<bundles_post_ra>
// kernel: tpu_custom_call.1
= control target key start
LH: loop header
LB: loop body
LE: loop exit
PB: predicated region body
PF: predicated region fallthrough
CT: control target
= control target key end

     0   :  { %11 = vsyncpa [#allocation3], 0  ;;  %s1214_s0 = inlined_call_operand.vmem [shape: f32[2,4,256], index: 0, kind: input, shape index: {}]   ;;  %s1215_s1 = inlined_call_operand.hbm [shape: f32[2,4,256], index: 1, kind: input, shape index: {}]   ;;  %s1216_s2 = inlined_call_operand.vmem [shape: f32[8,4], index: 2, kind: input, shape index: {}]   ;;  %s1217_s3 = inlined_call_operand.vmem [shape: f32[8,4], index: 3, kind: input, shape index: {}]   ;;  %s1218_s4 = inlined_call_operand.hbm [shape: f32[8,8], index: 4, kind: input, shape index: {}]   ;;  %s1219_s5 = inlined_call_operand.vmem [shape: f32[1,8], index: 5, kind: input, shape index: {}]   ;;  %s1220_s6 = inlined_call_operand.hbm [shape: f32[2,4,256], index: 6, kind: output, shape index: {}]  }
   0x1   :  { %13 = vsyncpa [#allocation3 + $0x1], 0 }
   0x2   :  { %14 = vsyncpa [#allocation6], 0 }
   0x3   :  { %15 = vsyncpa [#allocation4], 0 }
   0x4   :  { %17 = vsyncpa [#allocation4 + $0x1], 0  ;;  %s1045_s21 = smov 0   ;;  %s1047_s22 = smov 0  }
   0x5   :  { %s1049_s23 = smov 0   ;;  %s1051_s24 = smov 0  }
   0x6 LB: > { %s1066_s25 = sadd.s32 4294967295, %s1007_s24   ;;  %s769_s26 = sadd.s32 4294967294, %s1007_s24   ;;  %s1007_s24 = sphi %s1051_s24, %s1230_s24   ;;  %s1003_s23 = sphi %s1049_s23, %s1229_s23   ;;  %s999_s22 = sphi %s1047_s22, %s1228_s22   ;;  %s995_s21 = sphi %s1045_s21, %s1227_s21  }
   0x7   : > { %p69_p0 = scmp.ne.s32.totalorder %s999_s22, %s995_s21  ;;  %p70_p1 = scmp.eq.s32.totalorder %s1066_s25, 0 }
   0x8   : > { %p177_p2 = scmp.eq.s32.totalorder %s1066_s25, 1  ;;  %p183_p3 = scmp.eq.s32.totalorder %s769_s26, 1 }
   0x9   : > { %p1075_p4 = por %p70_p1, %p69_p0  ;;  %p770_p5 = scmp.ge.s32.totalorder %s1007_s24, 1 }
   0xa   : > { %p1080_p6 = por %p183_p3, %p69_p0  ;;  %p190_p7 = scmp.lt.s32.totalorder %s1007_s24, 3 }
   0xb   : > { %s208_s7 = sshll.u32 %s1218_s4, 4  ;;  %s1009_s9 = smov [#allocation5]   ;;  %s209_s7 = int_to_ptr.hbm [resolvable:$true] %s208_s7 }
   0xc   : > { %p1088_p8 = pnand %p770_p5, %p190_p7  ;;  %s210_s10 = sshll.u32 %s1009_s9, 4  ;;  %s211_s10 = int_to_ptr.vmem [resolvable:$true] %s210_s10 }
   0xd   : > { %s1098_s11 = sadd.s32 1, %s1007_s24   ;;  %s56_s12 = sadd.s32 1, %s1003_s23 }
   0xe   : > { %p812_p10 = pneg %p1088_p8  ;;  %s53_s13 = ssub.s32 %s1007_s24, %s1098_s11 }
   0xf   : > { %p54_p12 = scmp.eq.s32.totalorder %s53_s13, 0  ;;  %p63_p13 = scmp.ne.s32.totalorder %s1003_s23, %s999_s22 }
  0x10   : > { %p813_p11 = pnand %p812_p10, %p70_p1  ;;  %p64_p0 = scmp.eq.s32.totalorder %s1007_s24, 0 }
  0x11   : > { %s1107_s14 = scalar_select %p54_p12, %s1003_s23, %s56_s12  }
  0x12   : > { %815 = dma.hbm_to_vmem [thread:$0]  (!%p813_p11), %s209_s7, 128, %s211_s10, [#allocation6]  }
  0x13   : > { %p1111_p3 = por %p177_p2, %p63_p13  ;;  %p825_p5 = scmp.lt.s32.totalorder %s1007_s24, 2 }
  0x14   : > { %s232_s16 = sand.u32 1, %s1003_s23   ;;  %s801_s17 = sshll.u32 %s1007_s24, 3 }
  0x15   : > { %p65_p7 = por %p64_p0, %p63_p13  ;;  %s773_s18 = sshll.u32 %s232_s16, 3 }
  0x16   : > { %s241_s26 = scalar_lea.hbm %s1215_s1, %s801_s17  ;;  %s236_s30 = scalar_lea.vmem [#allocation2], %s773_s18 }
  0x17   : > { %s243_s29 = sshll.u32 %s241_s26, 4  ;;  %s245_s7 = sshll.u32 %s236_s30, 4  ;;  %s244_s29 = int_to_ptr.hbm [resolvable:$true] %s243_s29  ;;  %s246_s7 = int_to_ptr.vmem [resolvable:$true] %s245_s7 }
  0x18   : > { %p1121_p10 = pnand %p825_p5, %p65_p7  ;;  %s233_s10 = scalar_lea.sflag [#allocation3], %s232_s16 }
  0x19   : > { %s907_s12 = sshra.s32 %s244_s29, 4  ;;  %s914_s18 = scalar_lea.hbm %s1215_s1, 16  ;;  %s908_s12 = int_to_ptr.hbm [resolvable:$true] %s907_s12 }
  0x1a   : > { %s909_s13 = scalar_lea.hbm %s908_s12, 8  ;;  %p911_p11 = pneg %p1121_p10 }
  0x1b   : > { %p910_p2 = scmp.ne.s32.totalorder %s908_s12, %s909_s13  ;;  %p915_p0 = scmp.lt.s32.totalorder %s908_s12, %s1215_s1 }
  0x1c   : > { %p916_p5 = scmp.lt.s32.totalorder %s914_s18, %s909_s13 }
  0x1d   : > { %p912_p12 = pnand %p911_p11, %p910_p2 }
  0x1e   : > { %p917_p7 = por %p916_p5, %p915_p0 }
  0x1f   : > { %p913_p13 = pneg %p912_p12 }
  0x21   : > { %p918_p9 = pnand %p917_p7, %p913_p13 }
  0x23   : > { %921 = shalt.err (!%p918_p9)
}
  0x24   : > { %819 = dma.hbm_to_vmem [thread:$0]  (!%p1121_p10), %s244_s29, 128, %s246_s7, %s233_s10  }
  0x25   : > { %254 = sbr.rel (%p1088_p8) target bundleno = 1306 (0x51a), region = 44  ;;  %s1138_s16 = sand.u32 (!%p1088_p8), 1, %s999_s22  }
  0x26   : > { %s777_s30 = sshll.u32 (!%p1088_p8), %s1138_s16, 3  ;;  %s257_s17 = scalar_lea.sflag (!%p1088_p8), [#allocation3], %s1138_s16 }
  0x27   : > { %s260_s12 = scalar_lea.vmem (!%p1088_p8), [#allocation2], %s777_s30 }
  0x2a   : > { %982 = dma.done.wait (%p1075_p4), %s257_s17, 128  }
  0x2b   : > { %984 = vsyncadd (%p1075_p4), %s257_s17, 4294967168 }
  0x2c   : > { %986 = dma.done.wait (%p70_p1), [#allocation6], 128  }
  0x2d   : > { %988 = vsyncadd (%p70_p1), [#allocation6], 4294967168  ;;  %p300_p8 = scmp.lt.s32.totalorder %s1066_s25, 1  ;;  %vm315_vm0 = vcmask 1043456   ;;  %v1157_v1 = vld [vmem:[%s260_s12] sm:$0xff]  ;;  %v305_v2 = vld [vmem:[%s1216_s2] sm:$0xff] }
  0x2e   : > { %vm311_vm1 = vcmask 31744   ;;  %v385_v5 = vld [vmem:[%s1217_s3] sm:$0xff]  ;;  %v467_v56 = vld [vmem:[#allocation5] sm:$0xff]  ;;  %vm468_vm8 = vcmask 64512   ;;  %vm583_vm12 = vcmask 1040384   ;;  %s803_s17 = sshll.u32 %s1066_s25, 3 }
  0x2f   : > { %s301_s8 = scalar_select %p300_p8, %s1066_s25, 1 }
  0x30   : > { %s299_s25 = scalar_lea.vmem [#allocation7], %s777_s30  ;;  %s957_s30 = scalar_lea.hbm %s1220_s6, 16 }
  0x31   : > { %s802_s29 = sshll.u32 %s301_s8, 3  ;;  %s674_s7 = sshll.u32 %s299_s25, 4  ;;  %s675_s7 = int_to_ptr.vmem [resolvable:$true] %s674_s7 }
  0x32   : > { %s304_s10 = scalar_lea.vmem %s1214_s0, %s802_s29  ;;  %s672_s29 = scalar_lea.hbm %s1220_s6, %s803_s17 }
  0x33   : > { %v306_v0 = vld [vmem:[%s304_s10] sm:$0xff]  ;;  %s676_s9 = sshll.u32 %s672_s29, 4  ;;  %s661_s10 = scalar_lea.sflag [#allocation4], %s1138_s16  ;;  %s677_s9 = int_to_ptr.hbm [resolvable:$true] %s676_s9 }
  0x34   : > { %308 = vst [vmem:[#allocation1] ss:$2 sm:$0xff] %v306_v0  ;;  %s951_s27 = sshra.s32 %s677_s9, 4  ;;  %s952_s27 = int_to_ptr.hbm [resolvable:$true] %s951_s27 }
  0x35   : > { %s953_s13 = scalar_lea.hbm %s952_s27, 8  ;;  %p958_p10 = scmp.lt.s32.totalorder %s952_s27, %s1220_s6 }
  0x36   : > { %p954_p1 = scmp.ne.s32.totalorder %s952_s27, %s953_s13  ;;  %p959_p2 = scmp.lt.s32.totalorder %s957_s30, %s953_s13 }
  0x38   : > { %p955_p4 = pnand %p954_p1, %p1111_p3  ;;  %p960_p11 = por %p959_p2, %p958_p10 }
  0x3a   : > { %p956_p9 = pneg %p955_p4 }
  0x3b   : > { %v309_v3 = vld.sshfl [vmem:[#allocation1] sm:$0xff pattern:$0x75316420]  ;;  %v310_v4 = vld.sshfl [vmem:[#allocation1 + $0x8] sm:$0xff pattern:$0x75316420] }
  0x3c   : > { %782 = vmatpush.msk.msra.mxu0 %vm315_vm0, %v309_v3  ;;  %784 = vmatpush.msk.msra.mxu1 %vm315_vm0, %v310_v4  ;;  %388 = vst [vmem:[#allocation1] ss:$2 sm:$0xff] %v1157_v1  ;;  %p961_p12 = pnand %p960_p11, %p956_p9 }
  0x3d   : > { %783 = vmatmul.msk.f32.vlgmr.msra.gmra.mxu0 %vm311_vm1, %v305_v2  ;;  %785 = vmatmul.msk.f32.vlgmr.msra.gmra.mxu1 %vm311_vm1, %v305_v2 }
  0x43   : > { %v389_v6 = vld.sshfl [vmem:[#allocation1] sm:$0xff pattern:$0x75316420]  ;;  %v390_v7 = vld.sshfl [vmem:[#allocation1 + $0x8] sm:$0xff pattern:$0x75316420] }
  0x44   : > { %786 = vmatpush.msk.msra.mxu2 %vm315_vm0, %v389_v6  ;;  %788 = vmatpush.msk.msra.mxu3 %vm315_vm0, %v390_v7 }
  0x45   : > { %787 = vmatmul.msk.f32.vlgmr.msra.gmra.mxu2 %vm311_vm1, %v385_v5  ;;  %789 = vmatmul.msk.f32.vlgmr.msra.gmra.mxu3 %vm311_vm1, %v385_v5 }
  0xba   : > { %v337_v8 = vpop.f32.mrf.mxu0  ;;  %v357_v9 = vpop.f32.mrf.mxu1 }
  0xbb   : > { %v360_v10 = vadd.f32 %v357_v9, %v337_v8 }
  0xbd   : > { %361 = vadd.xlane.f32.xlu0 %v360_v10 }
  0xc8   : > { %v415_v11 = vpop.f32.mrf.mxu2  ;;  %v435_v12 = vpop.f32.mrf.mxu3 }
  0xc9   : > { %v438_v13 = vadd.f32 %v435_v12, %v415_v11 }
  0xcb   : > { %439 = vadd.xlane.f32.xlu0 %v438_v13 }
 0x130   : > { %v362_v14 = vpop.xlane.xlu0 %361 }
 0x131   : > { %v363_v15 = vmul.f32 0.00390625, %v362_v14 }
 0x133   : > { %v364_v16 = vsub.f32 %v337_v8, %v363_v15  ;;  %v365_v17 = vsub.f32 %v357_v9, %v363_v15 }
 0x135   : > { %v366_v18 = vmul.f32 %v364_v16, %v364_v16  ;;  %v367_v19 = vmul.f32 %v365_v17, %v365_v17 }
 0x137   : > { %v368_v20 = vadd.f32 %v367_v19, %v366_v18  ;;  %v539_v18 = vld [vmem:[%s1219_s5] sm:$0x1] }
 0x139   : > { %369 = vadd.xlane.f32.xlu1 %v368_v20 }
 0x13e   : > { %v440_v21 = vpop.xlane.xlu0 %439 }
 0x13f   : > { %v441_v22 = vmul.f32 0.00390625, %v440_v21 }
 0x141   : > { %v442_v23 = vsub.f32 %v415_v11, %v441_v22  ;;  %v443_v24 = vsub.f32 %v435_v12, %v441_v22 }
 0x143   : > { %v444_v25 = vmul.f32 %v442_v23, %v442_v23  ;;  %v445_v26 = vmul.f32 %v443_v24, %v443_v24 }
 0x145   : > { %v446_v27 = vadd.f32 %v445_v26, %v444_v25 }
 0x147   : > { %447 = vadd.xlane.f32.xlu1 %v446_v27 }
 0x1ac   : > { %v370_v28 = vpop.xlane.xlu1 %369 }
 0x1ad   : > { %v371_v29 = vmul.f32 0.00390625, %v370_v28 }
 0x1af   : > { %v372_v30 = vadd.f32 1e-05, %v371_v29 }
 0x1b1   : > { %861 = vrsqrt.f32 %v372_v30  ;;  %vm379_vm3 = vweird.f32 %v372_v30 }
 0x1b7   : > { %v862_v31 = vpop.eup %861 }
 0x1b8   : > { %v374_v32 = vmul.f32 %v862_v31, %v372_v30  ;;  %vm380_vm2 = vweird.f32 %v862_v31 }
 0x1b9   : > { %vm381_vm5 = vmor %vm379_vm3, %vm380_vm2 }
 0x1ba   : > { %v448_v33 = vpop.xlane.xlu1 %447  ;;  %v375_v36 = vmul.f32 %v862_v31, %v374_v32 }
 0x1bb   : > { %v449_v34 = vmul.f32 0.00390625, %v448_v33 }
 0x1bc   : > { %v376_v37 = vmul.f32 0.5, %v375_v36 }
 0x1bd   : > { %v450_v35 = vadd.f32 1e-05, %v449_v34 }
 0x1be   : > { %v377_v39 = vsub.f32 1.5, %v376_v37 }
 0x1bf   : > { %863 = vrsqrt.f32 %v450_v35  ;;  %vm457_vm6 = vweird.f32 %v450_v35 }
 0x1c0   : > { %v378_v43 = vmul.f32 %v862_v31, %v377_v39 }
 0x1c2   : > { %v382_v45 = vsel %vm381_vm5, %v862_v31, %v378_v43 }
 0x1c3   : > { %v383_v48 = vmul.f32 %v382_v45, %v364_v16  ;;  %v384_v50 = vmul.f32 %v382_v45, %v365_v17 }
 0x1c5   : > { %v864_v38 = vpop.eup %863 }
 0x1c6   : > { %v452_v40 = vmul.f32 %v864_v38, %v450_v35  ;;  %vm458_vm4 = vweird.f32 %v864_v38 }
 0x1c7   : > { %vm459_vm7 = vmor %vm457_vm6, %vm458_vm4 }
 0x1c8   : > { %v453_v41 = vmul.f32 %v864_v38, %v452_v40 }
 0x1ca   : > { %v454_v42 = vmul.f32 0.5, %v453_v41 }
 0x1cc   : > { %v455_v44 = vsub.f32 1.5, %v454_v42 }
 0x1ce   : > { %v456_v46 = vmul.f32 %v864_v38, %v455_v44 }
 0x1d0   : > { %v460_v47 = vsel %vm459_vm7, %v864_v38, %v456_v46 }
 0x1d1   : > { %v461_v49 = vmul.f32 %v460_v47, %v442_v23  ;;  %v462_v51 = vmul.f32 %v460_v47, %v443_v24 }
 0x1d3   : > { %v463_v52 = vadd.f32 %v461_v49, %v383_v48  ;;  %v464_v53 = vadd.f32 %v462_v51, %v384_v50 }
 0x1d5   : > { %v465_v54 = vmax.f32 %v463_v52, 0.0  ;;  %v466_v55 = vmax.f32 %v464_v53, 0.0 }
 0x1d7   : > { %487 = vmatpush.msrb.mxu0 %v465_v54  ;;  %507 = vmatpush.msrb.mxu1 %v466_v55 }
 0x1d8   : > { %790 = vmatmul.msk.f32.vlgmr.msrb.gmra.mxu0 %vm468_vm8, %v467_v56  ;;  %791 = vmatmul.msk.f32.vlgmr.msrb.gmra.mxu1 %vm468_vm8, %v467_v56 }
 0x255   : > { %v489_v57 = vpop.f32.mrf.mxu0  ;;  %v509_v58 = vpop.f32.mrf.mxu1 }
 0x256   : > { %v512_v59 = vadd.f32 %v509_v58, %v489_v57 }
 0x258   : > { %513 = vadd.xlane.f32.xlu2 %v512_v59 }
 0x2cb   : > { %v514_v60 = vpop.xlane.xlu2 %513 }
 0x2cc   : > { %v515_v61 = vmul.f32 0.00390625, %v514_v60 }
 0x2ce   : > { %v516_v62 = vsub.f32 %v489_v57, %v515_v61  ;;  %v517_v63 = vsub.f32 %v509_v58, %v515_v61 }
 0x2d0   : > { %v518_v0 = vmul.f32 %v516_v62, %v516_v62  ;;  %v519_v2 = vmul.f32 %v517_v63, %v517_v63 }
 0x2d2   : > { %v520_v3 = vadd.f32 %v519_v2, %v518_v0 }
 0x2d4   : > { %521 = vadd.xlane.f32.xlu2 %v520_v3 }
 0x347   : > { %v522_v4 = vpop.xlane.xlu2 %521 }
 0x348   : > { %v523_v5 = vmul.f32 0.00390625, %v522_v4 }
 0x34a   : > { %v524_v6 = vadd.f32 1e-05, %v523_v5 }
 0x34c   : > { %865 = vrsqrt.f32 %v524_v6  ;;  %vm531_vm10 = vweird.f32 %v524_v6 }
 0x352   : > { %v866_v7 = vpop.eup %865 }
 0x353   : > { %v526_v8 = vmul.f32 %v866_v7, %v524_v6  ;;  %vm532_vm9 = vweird.f32 %v866_v7 }
 0x354   : > { %vm533_vm11 = vmor %vm531_vm10, %vm532_vm9 }
 0x355   : > { %v527_v9 = vmul.f32 %v866_v7, %v526_v8 }
 0x357   : > { %v528_v10 = vmul.f32 0.5, %v527_v9 }
 0x359   : > { %v529_v11 = vsub.f32 1.5, %v528_v10 }
 0x35b   : > { %v530_v12 = vmul.f32 %v866_v7, %v529_v11 }
 0x35d   : > { %v534_v13 = vsel %vm533_vm11, %v866_v7, %v530_v12 }
 0x35e   : > { %v535_v14 = vmul.f32 %v534_v13, %v516_v62  ;;  %v536_v15 = vmul.f32 %v534_v13, %v517_v63 }
 0x360   : > { %v537_v16 = vmax.f32 %v535_v14, 0.0  ;;  %v538_v17 = vmax.f32 %v536_v15, 0.0 }
 0x362   : > { %558 = vmatpush.msrb.mxu2 %v537_v16  ;;  %578 = vmatpush.msrb.mxu3 %v538_v17 }
 0x363   : > { %792 = vmatmul.msk.f32.vlgmr.msrb.gmra.mxu2 %vm468_vm8, %v539_v18  ;;  %793 = vmatmul.msk.f32.vlgmr.msrb.gmra.mxu3 %vm468_vm8, %v539_v18 }
 0x3e6   : > { %v560_v19 = vpop.f32.mrf.mxu2  ;;  %v580_v20 = vpop.f32.mrf.mxu3 }
 0x3e7   : > { %v584_v21 = vsel %vm583_vm12, %v560_v19, 0.0  ;;  %v585_v22 = vsel %vm583_vm12, %v580_v20, 0.0 }
 0x3e8   : > { %v586_v23 = vadd.f32 %v585_v22, %v584_v21 }
 0x3ea   : > { %587 = vadd.xlane.f32.xlu0 %v586_v23 }
 0x45d   : > { %v588_v24 = vpop.xlane.xlu0 %587 }
 0x45e   : > { %v589_v25 = vmul.f32 0.00390625, %v588_v24 }
 0x460   : > { %v590_v26 = vsub.f32 %v560_v19, %v589_v25  ;;  %v591_v27 = vsub.f32 %v580_v20, %v589_v25 }
 0x462   : > { %v592_v28 = vmul.f32 %v590_v26, %v590_v26  ;;  %v593_v29 = vmul.f32 %v591_v27, %v591_v27 }
 0x464   : > { %v594_v30 = vsel %vm583_vm12, %v592_v28, 0.0  ;;  %v595_v31 = vsel %vm583_vm12, %v593_v29, 0.0 }
 0x465   : > { %v596_v32 = vadd.f32 %v595_v31, %v594_v30 }
 0x467   : > { %597 = vadd.xlane.f32.xlu1 %v596_v32 }
 0x4da   : > { %v598_v33 = vpop.xlane.xlu1 %597 }
 0x4db   : > { %v599_v34 = vmul.f32 0.00390625, %v598_v33 }
 0x4dd   : > { %v600_v35 = vadd.f32 1e-05, %v599_v34 }
 0x4df   : > { %867 = vrsqrt.f32 %v600_v35  ;;  %vm607_vm14 = vweird.f32 %v600_v35 }
 0x4e5   : > { %v868_v36 = vpop.eup %867 }
 0x4e6   : > { %v602_v37 = vmul.f32 %v868_v36, %v600_v35  ;;  %vm608_vm13 = vweird.f32 %v868_v36 }
 0x4e7   : > { %vm609_vm15 = vmor %vm607_vm14, %vm608_vm13 }
 0x4e8   : > { %v603_v38 = vmul.f32 %v868_v36, %v602_v37 }
 0x4ea   : > { %v604_v39 = vmul.f32 0.5, %v603_v38 }
 0x4ec   : > { %v605_v40 = vsub.f32 1.5, %v604_v39 }
 0x4ee   : > { %v606_v41 = vmul.f32 %v868_v36, %v605_v40 }
 0x4f0   : > { %v610_v42 = vsel %vm609_vm15, %v868_v36, %v606_v41 }
 0x4f1   : > { %v611_v43 = vmul.f32 %v610_v42, %v590_v26  ;;  %v612_v44 = vmul.f32 %v610_v42, %v591_v27 }
 0x4f3   : > { %v794_v45 = vmul.f32 -1.442695, %v611_v43  ;;  %v795_v46 = vmul.f32 -1.442695, %v612_v44 }
 0x4f5   : > { %869 = vpow2.f32 %v794_v45 }
 0x4f6   : > { %871 = vpow2.f32 %v795_v46 }
 0x4fb   : > { %v870_v47 = vpop.eup %869 }
 0x4fc   : > { %v872_v48 = vpop.eup %871  ;;  %v619_v49 = vadd.f32 1.0, %v870_v47 }
 0x4fd   : > { %v620_v50 = vadd.f32 1.0, %v872_v48 }
 0x4fe   : > { %873 = vrcp.f32 %v619_v49  ;;  %v632_v58 = vand.u32 2147483648, %v619_v49  ;;  %v630_v60 = vand.u32 2147483647, %v619_v49  ;;  %vm626_vm3 = vweird.f32 %v619_v49 }
 0x4ff   : > { %875 = vrcp.f32 %v620_v50  ;;  %v647_v59 = vand.u32 2147483648, %v620_v50  ;;  %v645_v62 = vand.u32 2147483647, %v620_v50  ;;  %vm641_vm5 = vweird.f32 %v620_v50 }
 0x500   : > { %v633_v3 = vor.u32 1.1754944e-38, %v632_v58  ;;  %vm631_vm7 = vcmp.eq.f32.partialorder %v630_v60, 8.507059e+37 }
 0x501   : > { %v648_v4 = vor.u32 1.1754944e-38, %v647_v59  ;;  %vm646_vm8 = vcmp.eq.f32.partialorder %v645_v62, 8.507059e+37 }
 0x504   : > { %v874_v51 = vpop.eup %873 }
 0x505   : > { %v876_v52 = vpop.eup %875  ;;  %v622_v53 = vmul.f32 %v874_v51, %v619_v49  ;;  %vm627_vm1 = vweird.f32 %v874_v51 }
 0x506   : > { %v637_v54 = vmul.f32 %v876_v52, %v620_v50  ;;  %vm642_vm2 = vweird.f32 %v876_v52  ;;  %vm628_vm4 = vmor %vm626_vm3, %vm627_vm1 }
 0x507   : > { %v623_v55 = vsub.f32 1.0, %v622_v53  ;;  %vm643_vm6 = vmor %vm641_vm5, %vm642_vm2 }
 0x508   : > { %v638_v56 = vsub.f32 1.0, %v637_v54 }
 0x509   : > { %v624_v57 = vmul.f32 %v874_v51, %v623_v55 }
 0x50a   : > { %v639_v61 = vmul.f32 %v876_v52, %v638_v56 }
 0x50b   : > { %v625_v63 = vadd.f32 %v874_v51, %v624_v57 }
 0x50c   : > { %v640_v0 = vadd.f32 %v876_v52, %v639_v61 }
 0x50d   : > { %v629_v2 = vsel %vm628_vm4, %v874_v51, %v625_v63 }
 0x50e   : > { %v644_v5 = vsel %vm643_vm6, %v876_v52, %v640_v0  ;;  %v634_v6 = vsel %vm631_vm7, %v633_v3, %v629_v2 }
 0x50f   : > { %v649_v7 = vsel %vm646_vm8, %v648_v4, %v644_v5  ;;  %v651_v9 = vperm.slane %v634_v6, 0 }
 0x510   : > { %v652_v8 = vperm.slane %v649_v7, 0 }
 0x512   : > { %v655_v10 = vrot.slane %v652_v8, 4 }
 0x514   : > { %v656_v11 = vsel %vm315_vm0, %v651_v9, %v655_v10 }
 0x515   : > { %v658_v12 = vmul.f32 %v656_v11, %v1157_v1 }
 0x517   : > { %659 = vst [vmem:[%s299_s25] sm:$0xff] %v658_v12 }
 0x518   : > { %964 = shalt.err (!%p961_p12)
}
 0x519   : > { %810 = dma.vmem_to_hbm [thread:$0]  (%p1111_p3), %s675_s7, 128, %s677_s9, %s661_s10  }
 0x51a PF: > { %s688_s16 = sand.u32 1, %s995_s21   ;;  %p1226_p13 = scmp.ge.s32.totalorder %s1007_s24, 2 }
 0x51b   : > { %s689_s17 = scalar_lea.sflag [#allocation4], %s688_s16 }
 0x51c   : > { %p821_p0 = pnand %p1226_p13, %p1080_p6 }
 0x51e   : > { %p822_p5 = pneg %p821_p0 }
 0x520   : > { %990 = dma.done.wait (%p822_p5), %s689_s17, 128  }
 0x521   : > { %992 = vsyncadd (%p822_p5), %s689_s17, 4294967168  ;;  %p20_p7 = scmp.ge.s32.totalorder %s1098_s11, 4   ;;  %s1227_s21 = smov %s999_s22 }
 0x522   : > { %s1228_s22 = smov %s1003_s23  ;;  %s1229_s23 = smov %s1107_s14 }
 0x523   : > { %s1230_s24 = smov %s1098_s11  ;;  %22 = sbr.rel (!%p20_p7) target bundleno = 6 (0x6), region = 96 }
 0x528   :  { %695 = vsyncpa [#allocation3], 1 }
 0x529   :  { %697 = vsyncpa [#allocation3 + $0x1], 1 }
 0x52a   :  { %698 = vsyncpa [#allocation6], 1 }
 0x52b   :  { %699 = vsyncpa [#allocation4], 1 }
 0x52c   :  { %701 = vsyncpa [#allocation4 + $0x1], 1 }

</bundles_post_ra>
